<compile_context>
chip_gen: v7x
topology: tpu7x:2x2x1
jax: 0.10.0
libtpu: 0.0.40
codegen_flags: <defaults>
</compile_context>

<pallas_src>
import functools

import jax
import jax.numpy as jnp
import numpy as np
from jax.experimental import pallas as pl
from jax.experimental.pallas import tpu as pltpu


def _round_up(x, m):
    return ((x + m - 1) // m) * m


def isd_loss_kernel(lam_ref, g_ref, conf_ref, loc_ref, conf_sh_ref,
                    conf_int_ref, loc_sh_ref, loc_int_ref,
                    acc_ab_ref, acc_l_ref, acc_r_ref,
                    cnt_i_ref, cnt_l_ref, cnt_r_ref):
    # Init the per-batch resident accumulators at the first anchor tile of each
    # batch block (works with the batch axis split across TensorCores).
    @pl.when(pl.program_id(1) == 0)
    def _init():
        acc_ab_ref[...] = jnp.zeros_like(acc_ab_ref)
        acc_l_ref[...] = jnp.zeros_like(acc_l_ref)
        acc_r_ref[...] = jnp.zeros_like(acc_r_ref)
        cnt_i_ref[...] = jnp.zeros_like(cnt_i_ref)
        cnt_l_ref[...] = jnp.zeros_like(cnt_l_ref)
        cnt_r_ref[...] = jnp.zeros_like(cnt_r_ref)

    f32 = jnp.float32
    lam = lam_ref[0]
    eps = f32(1e-7)

    # Blocks are (rows_tile, 128): anchors*coords flattened onto lanes,
    # fully dense in both sublanes and lanes.  Cast in-kernel (bf16 OK).
    conf = conf_ref[...].astype(f32)
    conf_temp = conf_sh_ref[...].astype(f32)     # batch-half swap in index_map
    conf_int = conf_int_ref[...].astype(f32)
    loc = loc_ref[...].astype(f32)
    loc_temp = loc_sh_ref[...].astype(f32)       # batch-half swap in index_map
    loc_int = loc_int_ref[...].astype(f32)

    # --- the two distinct "inter" logs, each computed exactly once (EUP) ---
    conf_int_eps = conf_int + eps
    mixed = conf_temp + lam * (conf - conf_temp) + eps     # FMA-friendly
    log_mixed = jnp.log(mixed)
    log_ci = jnp.log(conf_int_eps)
    # symmetric KL pair collapsed algebraically:
    #   ci*(log ci - log mixed) + mixed*(log mixed - log ci)
    kl_ab = (conf_int_eps - mixed) * (log_ci - log_mixed)

    conf_eps = conf + eps
    conf_temp_eps = conf_temp + eps
    kl_left = conf_eps * (jnp.log(conf_eps) - log_ci)
    kl_right = conf_temp_eps * (jnp.log(conf_temp_eps) - log_ci)

    d_l = loc_int - loc
    d_r = loc_int - loc_temp

    # --- per-anchor masks: OR of (conf > 0.5) over each aligned group of 4
    # lanes, via a block-diagonal 0/1 matmul on the idle MXU ---
    g = g_ref[...]                                     # (128, 128) 4x4-block-diag
    ind_l = (conf > 0.5).astype(f32)
    ind_r = (conf_temp > 0.5).astype(f32)
    grp_l = jnp.dot(ind_l, g, preferred_element_type=f32)
    grp_r = jnp.dot(ind_r, g, preferred_element_type=f32)
    left_f = (grp_l > 0.5).astype(f32)                 # anchor mask, per lane
    right_f = (grp_r > 0.5).astype(f32)
    m_i = left_f * right_f
    m_l = left_f - m_i
    m_r = right_f - m_i

    rt = conf.shape[0]
    lanes = conf.shape[1]

    def red(x):
        # (rt, 128) -> (8, 128): vreg-aligned fold, pure VALU adds.
        return jnp.sum(x.reshape(rt // 8, 8, lanes), axis=0)

    acc_ab_ref[...] += red(m_i * kl_ab)
    acc_l_ref[...] += red(m_l * (kl_left + 0.25 * (d_l * d_l)))
    acc_r_ref[...] += red(m_r * (kl_right + 0.25 * (d_r * d_r)))
    cnt_i_ref[...] += red(m_i)      # each anchor contributes 4 (one per coord)
    cnt_l_ref[...] += red(m_l)
    cnt_r_ref[...] += red(m_r)


@functools.partial(jax.jit, static_argnums=(0, 1))
def _isd_loss_impl(batch_size, rows_tile, lam, conf, loc, conf_shuffle,
                   conf_interpolation, loc_shuffle, loc_interpolation):
    B, A, C = conf.shape
    half = batch_size // 2
    F = A * C                                     # flattened anchors*coords

    # Effective tile height (multiple of 8 sublanes), clamped for tiny inputs.
    r0 = -(-F // 128)
    rt = min(_round_up(int(rows_tile), 8), _round_up(r0, 8))
    tile_flat = rt * 128
    F_pad = _round_up(F, tile_flat)
    num_r = F_pad // tile_flat

    def prep(x):
        x = x.reshape(B, F)                       # free (contiguous)
        if F_pad != F:
            # zero pad: padded lanes have conf 0 (< 0.5) -> masked out.
            # TODO(synk): in-kernel tail masking would make this copy-free too.
            x = jnp.pad(x, ((0, 0), (0, F_pad - F)))
        return x.reshape(B, F_pad // 128, 128)    # free

    lam_arr = jnp.reshape(jnp.asarray(lam, dtype=jnp.float32), (1,))
    lane = jnp.arange(128)
    group_or = (lane[:, None] // 4 == lane[None, :] // 4).astype(jnp.float32)

    data_spec = pl.BlockSpec((None, rt, 128), lambda b, r: (b, r, 0))
    # batch-half swap folded into the index_map (no concat / extra HBM pass)
    swap_spec = pl.BlockSpec((None, rt, 128),
                             lambda b, r: ((b + half) % B, r, 0))
    g_spec = pl.BlockSpec((128, 128), lambda b, r: (0, 0))
    acc_spec = pl.BlockSpec((None, 8, 128), lambda b, r: (b, 0, 0))

    out_shape = (jax.ShapeDtypeStruct((B, 8, 128), jnp.float32),) * 6

    # VMEM: 6 inputs x 2 buffers x rt*128*4B (rt=1024 -> ~6 MiB) + G + tiny
    # accumulators; fits every generation's scoped default, incl. v7x megacore.
    acc_ab, acc_l, acc_r, cnt_i, cnt_l, cnt_r = pl.pallas_call(
        isd_loss_kernel,
        out_shape=out_shape,
        grid=(B, num_r),
        in_specs=[pl.BlockSpec(memory_space=pltpu.MemorySpace.SMEM),  # lam
                  g_spec,      # block-diagonal group-OR matrix
                  data_spec,   # conf
                  data_spec,   # loc
                  swap_spec,   # conf_shuffle -> conf_temp via index_map
                  data_spec,   # conf_interpolation
                  swap_spec,   # loc_shuffle  -> loc_temp via index_map
                  data_spec],  # loc_interpolation
        out_specs=(acc_spec,) * 6,
        compiler_params=pltpu.CompilerParams(
            dimension_semantics=("parallel", "arbitrary")),
    )(lam_arr, group_or, prep(conf), prep(loc), prep(conf_shuffle),
      prep(conf_interpolation), prep(loc_shuffle), prep(loc_interpolation))

    # tiny final reductions / divisions / count>0 guards in plain JAX
    sum_ab = jnp.sum(acc_ab)
    sum_l = jnp.sum(acc_l)
    sum_r = jnp.sum(acc_r)
    n_i = jnp.sum(cnt_i) * 0.25     # masks counted once per coord lane
    n_l = jnp.sum(cnt_l) * 0.25
    n_r = jnp.sum(cnt_r) * 0.25

    inter_loss = jnp.where(n_i > 0.0, 0.5 * sum_ab / jnp.maximum(n_i, 1.0), 0.0)
    left_loss = jnp.where(n_l > 0.0, sum_l / jnp.maximum(n_l, 1.0), 0.0)
    right_loss = jnp.where(n_r > 0.0, sum_r / jnp.maximum(n_r, 1.0), 0.0)
    return inter_loss, left_loss + right_loss


def isd_loss(batch_size, lam, conf, loc, conf_shuffle, conf_interpolation,
             loc_shuffle, loc_interpolation, rows_tile=1024):
    """Returns (interpolation_consistency_conf_loss, fixmatch_loss)."""
    batch_size = int(batch_size)
    if conf.shape[0] != batch_size:
        raise ValueError(f"batch_size={batch_size} != conf.shape[0]={conf.shape[0]}")
    if batch_size % 2 != 0:
        raise ValueError("ISDLoss half-swap requires an even batch size")
    return _isd_loss_impl(batch_size, int(rows_tile), lam, conf, loc,
                          conf_shuffle, conf_interpolation, loc_shuffle,
                          loc_interpolation)


# ------------------------- pure numpy reference -------------------------
def ref_isd(batch_size, lam, conf, loc, conf_sh, conf_int, loc_sh, loc_int):
    conf, loc = np.asarray(conf, np.float64), np.asarray(loc, np.float64)
    conf_sh, conf_int = np.asarray(conf_sh, np.float64), np.asarray(conf_int, np.float64)
    loc_sh, loc_int = np.asarray(loc_sh, np.float64), np.asarray(loc_int, np.float64)
    half = batch_size // 2
    conf_temp = np.concatenate([conf_sh[half:], conf_sh[:half]], axis=0)
    loc_temp = np.concatenate([loc_sh[half:], loc_sh[:half]], axis=0)
    left = conf.max(-1) > 0.5
    right = conf_temp.max(-1) > 0.5
    only_left = left & ~right
    only_right = right & ~left
    inter = left & right
    eps = 1e-7

    def kld(inp_log, t):
        return np.where(t > 0, t * (np.log(t) - inp_log), 0.0)

    if inter.sum() > 0:
        cl, cr, ci = conf[inter], conf_temp[inter], conf_int[inter]
        mixed = lam * cl + (1 - lam) * cr + eps
        ci = ci + eps
        a = kld(np.log(mixed), ci).sum(-1).mean()
        b = kld(np.log(ci), mixed).sum(-1).mean()
        inter_loss = (a + b) / 2.0
    else:
        inter_loss = 0.0

    def branch(mask, c_tgt, l_tgt):
        if mask.sum() == 0:
            return 0.0
        ct = c_tgt[mask] + eps
        ci = conf_int[mask] + eps
        conf_l = kld(np.log(ci), ct).sum(-1).mean()
        li, lt = loc_int[mask], l_tgt[mask]
        loc_l = sum(np.mean((li[:, k] - lt[:, k]) ** 2) for k in range(4)) / 4.0
        return conf_l + loc_l

    fixmatch = branch(only_left, conf, loc) + branch(only_right, conf_temp, loc_temp)
    return inter_loss, fixmatch


if __name__ == "__main__":
    def make_inputs(key, B, A, C=4):
        ks = jax.random.split(key, 6)
        conf = jax.nn.softmax(2.0 * jax.random.normal(ks[0], (B, A, C)), axis=-1)
        conf_shuffle = jax.nn.softmax(2.0 * jax.random.normal(ks[1], (B, A, C)), axis=-1)
        conf_interp = jax.nn.softmax(2.0 * jax.random.normal(ks[2], (B, A, C)), axis=-1)
        loc = jax.random.normal(ks[3], (B, A, C))
        loc_shuffle = jax.random.normal(ks[4], (B, A, C))
        loc_interp = jax.random.normal(ks[5], (B, A, C))
        return conf, loc, conf_shuffle, conf_interp, loc_shuffle, loc_interp

    # case 1: small shapes, single anchor tile (tile auto-clamped)
    B, A, lam = 4, 64, 0.7
    conf, loc, conf_sh, conf_int, loc_sh, loc_int = make_inputs(
        jax.random.PRNGKey(0), B, A)
    inter_loss, fixmatch_loss = isd_loss(B, lam, conf, loc, conf_sh, conf_int,
                                         loc_sh, loc_int)
    jax.block_until_ready((inter_loss, fixmatch_loss))
    ref_inter, ref_fix = ref_isd(B, lam, conf, loc, conf_sh, conf_int,
                                 loc_sh, loc_int)
    np.testing.assert_allclose(float(inter_loss), ref_inter, rtol=2e-4, atol=1e-5)
    np.testing.assert_allclose(float(fixmatch_loss), ref_fix, rtol=2e-4, atol=1e-5)

    # case 2: unaligned anchor count (exercises zero-pad path + half-swap, B=2)
    B2, A2, lam2 = 2, 200, 0.3
    conf2, loc2, conf_sh2, conf_int2, loc_sh2, loc_int2 = make_inputs(
        jax.random.PRNGKey(1), B2, A2)
    i2, f2 = isd_loss(B2, lam2, conf2, loc2, conf_sh2, conf_int2,
                      loc_sh2, loc_int2)
    jax.block_until_ready((i2, f2))
    r_i2, r_f2 = ref_isd(B2, lam2, conf2, loc2, conf_sh2, conf_int2,
                         loc_sh2, loc_int2)
    np.testing.assert_allclose(float(i2), r_i2, rtol=2e-4, atol=1e-5)
    np.testing.assert_allclose(float(f2), r_f2, rtol=2e-4, atol=1e-5)

    # case 3: aligned (copy-free) path with multiple anchor tiles per batch row
    B3, A3, lam3 = 2, 512, 0.5          # F = 2048 = 2 tiles of rows_tile=8
    conf3, loc3, conf_sh3, conf_int3, loc_sh3, loc_int3 = make_inputs(
        jax.random.PRNGKey(2), B3, A3)
    i3, f3 = isd_loss(B3, lam3, conf3, loc3, conf_sh3, conf_int3,
                      loc_sh3, loc_int3, rows_tile=8)
    jax.block_until_ready((i3, f3))
    r_i3, r_f3 = ref_isd(B3, lam3, conf3, loc3, conf_sh3, conf_int3,
                         loc_sh3, loc_int3)
    np.testing.assert_allclose(float(i3), r_i3, rtol=2e-4, atol=1e-5)
    np.testing.assert_allclose(float(f3), r_f3, rtol=2e-4, atol=1e-5)

    print("KERNEL_OK")
</pallas_src>

<mosaic_0001>
module attributes {stable_mosaic.version = 11 : i64} {
  func.func @isd_loss_kernel(%arg0: i32, %arg1: i32, %arg2: memref<1xf32, #tpu.memory_space<smem>>, %arg3: memref<128x128xf32, #tpu.memory_space<vmem>>, %arg4: memref<1x8x128xf32, #tpu.memory_space<vmem>>, %arg5: memref<1x8x128xf32, #tpu.memory_space<vmem>>, %arg6: memref<1x8x128xf32, #tpu.memory_space<vmem>>, %arg7: memref<1x8x128xf32, #tpu.memory_space<vmem>>, %arg8: memref<1x8x128xf32, #tpu.memory_space<vmem>>, %arg9: memref<1x8x128xf32, #tpu.memory_space<vmem>>, %arg10: memref<1x8x128xf32, #tpu.memory_space<vmem>>, %arg11: memref<1x8x128xf32, #tpu.memory_space<vmem>>, %arg12: memref<1x8x128xf32, #tpu.memory_space<vmem>>, %arg13: memref<1x8x128xf32, #tpu.memory_space<vmem>>, %arg14: memref<1x8x128xf32, #tpu.memory_space<vmem>>, %arg15: memref<1x8x128xf32, #tpu.memory_space<vmem>>) attributes {dimension_semantics = [#tpu.dimension_semantics<parallel>, #tpu.dimension_semantics<arbitrary>], iteration_bounds = array<i64: 4, 1>, scalar_prefetch = 0 : i64, scratch_operands = 0 : i64, tpu.core_type = #tpu.core_type<tc>, window_params = [{transform_indices = @transform_0, window_bounds = array<i64: 1>}, {pipeline_mode = #tpu.pipeline_mode<synchronous>, transform_indices = @transform_1, window_bounds = array<i64: 128, 128>}, {transform_indices = @transform_2, window_bounds = array<i64: 1, 8, 128>}, {transform_indices = @transform_3, window_bounds = array<i64: 1, 8, 128>}, {transform_indices = @transform_4, window_bounds = array<i64: 1, 8, 128>}, {transform_indices = @transform_5, window_bounds = array<i64: 1, 8, 128>}, {transform_indices = @transform_6, window_bounds = array<i64: 1, 8, 128>}, {transform_indices = @transform_7, window_bounds = array<i64: 1, 8, 128>}, {transform_indices = @transform_8, window_bounds = array<i64: 1, 8, 128>}, {transform_indices = @transform_9, window_bounds = array<i64: 1, 8, 128>}, {transform_indices = @transform_10, window_bounds = array<i64: 1, 8, 128>}, {transform_indices = @transform_11, window_bounds = array<i64: 1, 8, 128>}, {transform_indices = @transform_12, window_bounds = array<i64: 1, 8, 128>}, {transform_indices = @transform_13, window_bounds = array<i64: 1, 8, 128>}]} {
    %c0_i32 = arith.constant 0 : i32
    %0 = arith.cmpi eq, %arg1, %c0_i32 : i32
    %1 = arith.extui %0 : i1 to i32
    %c0_i32_0 = arith.constant 0 : i32
    %2 = arith.cmpi ne, %1, %c0_i32_0 : i32
    scf.if %2 {
      %cst_74 = arith.constant 0.000000e+00 : f32
      %122 = vector.broadcast %cst_74 : f32 to vector<8x128xf32>
      %c0_75 = arith.constant 0 : index
      %c0_76 = arith.constant 0 : index
      %c0_77 = arith.constant 0 : index
      %123 = vector.load %arg10[%c0_75, %c0_76, %c0_77] : memref<1x8x128xf32, #tpu.memory_space<vmem>>, vector<1x8x128xf32>
      %124 = vector.shape_cast %123 : vector<1x8x128xf32> to vector<8x128xf32>
      %125 = vector.shape_cast %122 : vector<8x128xf32> to vector<1x8x128xf32>
      tpu.vector_store %arg10[%c0_75, %c0_76, %c0_77], %125 {strides = array<i32>} : memref<1x8x128xf32, #tpu.memory_space<vmem>>, vector<1x8x128xf32>,
      %cst_78 = arith.constant 0.000000e+00 : f32
      %126 = vector.broadcast %cst_78 : f32 to vector<8x128xf32>
      %c0_79 = arith.constant 0 : index
      %c0_80 = arith.constant 0 : index
      %c0_81 = arith.constant 0 : index
      %127 = vector.load %arg11[%c0_79, %c0_80, %c0_81] : memref<1x8x128xf32, #tpu.memory_space<vmem>>, vector<1x8x128xf32>
      %128 = vector.shape_cast %127 : vector<1x8x128xf32> to vector<8x128xf32>
      %129 = vector.shape_cast %126 : vector<8x128xf32> to vector<1x8x128xf32>
      tpu.vector_store %arg11[%c0_79, %c0_80, %c0_81], %129 {strides = array<i32>} : memref<1x8x128xf32, #tpu.memory_space<vmem>>, vector<1x8x128xf32>,
      %cst_82 = arith.constant 0.000000e+00 : f32
      %130 = vector.broadcast %cst_82 : f32 to vector<8x128xf32>
      %c0_83 = arith.constant 0 : index
      %c0_84 = arith.constant 0 : index
      %c0_85 = arith.constant 0 : index
      %131 = vector.load %arg12[%c0_83, %c0_84, %c0_85] : memref<1x8x128xf32, #tpu.memory_space<vmem>>, vector<1x8x128xf32>
      %132 = vector.shape_cast %131 : vector<1x8x128xf32> to vector<8x128xf32>
      %133 = vector.shape_cast %130 : vector<8x128xf32> to vector<1x8x128xf32>
      tpu.vector_store %arg12[%c0_83, %c0_84, %c0_85], %133 {strides = array<i32>} : memref<1x8x128xf32, #tpu.memory_space<vmem>>, vector<1x8x128xf32>,
      %cst_86 = arith.constant 0.000000e+00 : f32
      %134 = vector.broadcast %cst_86 : f32 to vector<8x128xf32>
      %c0_87 = arith.constant 0 : index
      %c0_88 = arith.constant 0 : index
      %c0_89 = arith.constant 0 : index
      %135 = vector.load %arg13[%c0_87, %c0_88, %c0_89] : memref<1x8x128xf32, #tpu.memory_space<vmem>>, vector<1x8x128xf32>
      %136 = vector.shape_cast %135 : vector<1x8x128xf32> to vector<8x128xf32>
      %137 = vector.shape_cast %134 : vector<8x128xf32> to vector<1x8x128xf32>
      tpu.vector_store %arg13[%c0_87, %c0_88, %c0_89], %137 {strides = array<i32>} : memref<1x8x128xf32, #tpu.memory_space<vmem>>, vector<1x8x128xf32>,
      %cst_90 = arith.constant 0.000000e+00 : f32
      %138 = vector.broadcast %cst_90 : f32 to vector<8x128xf32>
      %c0_91 = arith.constant 0 : index
      %c0_92 = arith.constant 0 : index
      %c0_93 = arith.constant 0 : index
      %139 = vector.load %arg14[%c0_91, %c0_92, %c0_93] : memref<1x8x128xf32, #tpu.memory_space<vmem>>, vector<1x8x128xf32>
      %140 = vector.shape_cast %139 : vector<1x8x128xf32> to vector<8x128xf32>
      %141 = vector.shape_cast %138 : vector<8x128xf32> to vector<1x8x128xf32>
      tpu.vector_store %arg14[%c0_91, %c0_92, %c0_93], %141 {strides = array<i32>} : memref<1x8x128xf32, #tpu.memory_space<vmem>>, vector<1x8x128xf32>,
      %cst_94 = arith.constant 0.000000e+00 : f32
      %142 = vector.broadcast %cst_94 : f32 to vector<8x128xf32>
      %c0_95 = arith.constant 0 : index
      %c0_96 = arith.constant 0 : index
      %c0_97 = arith.constant 0 : index
      %143 = vector.load %arg15[%c0_95, %c0_96, %c0_97] : memref<1x8x128xf32, #tpu.memory_space<vmem>>, vector<1x8x128xf32>
      %144 = vector.shape_cast %143 : vector<1x8x128xf32> to vector<8x128xf32>
      %145 = vector.shape_cast %142 : vector<8x128xf32> to vector<1x8x128xf32>
      tpu.vector_store %arg15[%c0_95, %c0_96, %c0_97], %145 {strides = array<i32>} : memref<1x8x128xf32, #tpu.memory_space<vmem>>, vector<1x8x128xf32>,
    } else {
    }
    %c0 = arith.constant 0 : index
    %3 = memref.load %arg2[%c0] : memref<1xf32, #tpu.memory_space<smem>>
    %c0_1 = arith.constant 0 : index
    %c0_2 = arith.constant 0 : index
    %c0_3 = arith.constant 0 : index
    %4 = vector.load %arg4[%c0_1, %c0_2, %c0_3] : memref<1x8x128xf32, #tpu.memory_space<vmem>>, vector<1x8x128xf32>
    %5 = vector.shape_cast %4 : vector<1x8x128xf32> to vector<8x128xf32>
    %c0_4 = arith.constant 0 : index
    %c0_5 = arith.constant 0 : index
    %c0_6 = arith.constant 0 : index
    %6 = vector.load %arg6[%c0_4, %c0_5, %c0_6] : memref<1x8x128xf32, #tpu.memory_space<vmem>>, vector<1x8x128xf32>
    %7 = vector.shape_cast %6 : vector<1x8x128xf32> to vector<8x128xf32>
    %c0_7 = arith.constant 0 : index
    %c0_8 = arith.constant 0 : index
    %c0_9 = arith.constant 0 : index
    %8 = vector.load %arg7[%c0_7, %c0_8, %c0_9] : memref<1x8x128xf32, #tpu.memory_space<vmem>>, vector<1x8x128xf32>
    %9 = vector.shape_cast %8 : vector<1x8x128xf32> to vector<8x128xf32>
    %c0_10 = arith.constant 0 : index
    %c0_11 = arith.constant 0 : index
    %c0_12 = arith.constant 0 : index
    %10 = vector.load %arg5[%c0_10, %c0_11, %c0_12] : memref<1x8x128xf32, #tpu.memory_space<vmem>>, vector<1x8x128xf32>
    %11 = vector.shape_cast %10 : vector<1x8x128xf32> to vector<8x128xf32>
    %c0_13 = arith.constant 0 : index
    %c0_14 = arith.constant 0 : index
    %c0_15 = arith.constant 0 : index
    %12 = vector.load %arg8[%c0_13, %c0_14, %c0_15] : memref<1x8x128xf32, #tpu.memory_space<vmem>>, vector<1x8x128xf32>
    %13 = vector.shape_cast %12 : vector<1x8x128xf32> to vector<8x128xf32>
    %c0_16 = arith.constant 0 : index
    %c0_17 = arith.constant 0 : index
    %c0_18 = arith.constant 0 : index
    %14 = vector.load %arg9[%c0_16, %c0_17, %c0_18] : memref<1x8x128xf32, #tpu.memory_space<vmem>>, vector<1x8x128xf32>
    %15 = vector.shape_cast %14 : vector<1x8x128xf32> to vector<8x128xf32>
    %cst = arith.constant 1.000000e-07 : f32
    %16 = vector.broadcast %cst : f32 to vector<8x128xf32>
    %17 = arith.addf %9, %16 : vector<8x128xf32>
    %18 = arith.subf %5, %7 : vector<8x128xf32>
    %19 = vector.broadcast %3 : f32 to vector<8x128xf32>
    %20 = arith.mulf %19, %18 : vector<8x128xf32>
    %21 = arith.addf %7, %20 : vector<8x128xf32>
    %cst_19 = arith.constant 1.000000e-07 : f32
    %22 = vector.broadcast %cst_19 : f32 to vector<8x128xf32>
    %23 = arith.addf %21, %22 : vector<8x128xf32>
    %24 = math.log %23 : vector<8x128xf32>
    %25 = math.log %17 : vector<8x128xf32>
    %26 = arith.subf %17, %23 : vector<8x128xf32>
    %27 = arith.subf %25, %24 : vector<8x128xf32>
    %28 = arith.mulf %26, %27 : vector<8x128xf32>
    %cst_20 = arith.constant 1.000000e-07 : f32
    %29 = vector.broadcast %cst_20 : f32 to vector<8x128xf32>
    %30 = arith.addf %5, %29 : vector<8x128xf32>
    %cst_21 = arith.constant 1.000000e-07 : f32
    %31 = vector.broadcast %cst_21 : f32 to vector<8x128xf32>
    %32 = arith.addf %7, %31 : vector<8x128xf32>
    %33 = math.log %30 : vector<8x128xf32>
    %34 = arith.subf %33, %25 : vector<8x128xf32>
    %35 = arith.mulf %30, %34 : vector<8x128xf32>
    %36 = math.log %32 : vector<8x128xf32>
    %37 = arith.subf %36, %25 : vector<8x128xf32>
    %38 = arith.mulf %32, %37 : vector<8x128xf32>
    %39 = arith.subf %15, %11 : vector<8x128xf32>
    %40 = arith.subf %15, %13 : vector<8x128xf32>
    %c0_22 = arith.constant 0 : index
    %c0_23 = arith.constant 0 : index
    %41 = vector.load %arg3[%c0_22, %c0_23] : memref<128x128xf32, #tpu.memory_space<vmem>>, vector<128x128xf32>
    %cst_24 = arith.constant 5.000000e-01 : f32
    %42 = vector.broadcast %cst_24 : f32 to vector<8x128xf32>
    %43 = arith.cmpf ogt, %5, %42 : vector<8x128xf32>
    %44 = arith.extui %43 : vector<8x128xi1> to vector<8x128xi32>
    %45 = arith.sitofp %44 : vector<8x128xi32> to vector<8x128xf32>
    %cst_25 = arith.constant 5.000000e-01 : f32
    %46 = vector.broadcast %cst_25 : f32 to vector<8x128xf32>
    %47 = arith.cmpf ogt, %7, %46 : vector<8x128xf32>
    %48 = arith.extui %47 : vector<8x128xi1> to vector<8x128xi32>
    %49 = arith.sitofp %48 : vector<8x128xi32> to vector<8x128xf32>
    %cst_26 = arith.constant dense<0.000000e+00> : vector<8x128xf32>
    %50 = tpu.matmul %45, %41, %cst_26 {dimension_numbers = #tpu.dot_dimension_numbers<[1], [0], [0], [1], [0, 0, 1, 1], [], []>} : vector<8x128xf32>, vector<128x128xf32>, vector<8x128xf32> -> vector<8x128xf32>
    %cst_27 = arith.constant dense<0.000000e+00> : vector<8x128xf32>
    %51 = tpu.matmul %49, %41, %cst_27 {dimension_numbers = #tpu.dot_dimension_numbers<[1], [0], [0], [1], [0, 0, 1, 1], [], []>} : vector<8x128xf32>, vector<128x128xf32>, vector<8x128xf32> -> vector<8x128xf32>
    %cst_28 = arith.constant 5.000000e-01 : f32
    %52 = vector.broadcast %cst_28 : f32 to vector<8x128xf32>
    %53 = arith.cmpf ogt, %50, %52 : vector<8x128xf32>
    %54 = arith.extui %53 : vector<8x128xi1> to vector<8x128xi32>
    %55 = arith.sitofp %54 : vector<8x128xi32> to vector<8x128xf32>
    %cst_29 = arith.constant 5.000000e-01 : f32
    %56 = vector.broadcast %cst_29 : f32 to vector<8x128xf32>
    %57 = arith.cmpf ogt, %51, %56 : vector<8x128xf32>
    %58 = arith.extui %57 : vector<8x128xi1> to vector<8x128xi32>
    %59 = arith.sitofp %58 : vector<8x128xi32> to vector<8x128xf32>
    %60 = arith.mulf %55, %59 : vector<8x128xf32>
    %61 = arith.subf %55, %60 : vector<8x128xf32>
    %62 = arith.subf %59, %60 : vector<8x128xf32>
    %c0_30 = arith.constant 0 : index
    %c0_31 = arith.constant 0 : index
    %c0_32 = arith.constant 0 : index
    %63 = vector.load %arg10[%c0_30, %c0_31, %c0_32] : memref<1x8x128xf32, #tpu.memory_space<vmem>>, vector<1x8x128xf32>
    %64 = vector.shape_cast %63 : vector<1x8x128xf32> to vector<8x128xf32>
    %65 = arith.mulf %60, %28 : vector<8x128xf32>
    %66 = vector.shape_cast %65 : vector<8x128xf32> to vector<1x8x128xf32>
    %cst_33 = arith.constant dense<0.000000e+00> : vector<8x128xf32>
    %67 = vector.multi_reduction <add>, %66, %cst_33 [0] : vector<1x8x128xf32> to vector<8x128xf32>
    %68 = arith.addf %64, %67 : vector<8x128xf32>
    %c0_34 = arith.constant 0 : index
    %c0_35 = arith.constant 0 : index
    %c0_36 = arith.constant 0 : index
    %69 = vector.load %arg10[%c0_34, %c0_35, %c0_36] : memref<1x8x128xf32, #tpu.memory_space<vmem>>, vector<1x8x128xf32>
    %70 = vector.shape_cast %69 : vector<1x8x128xf32> to vector<8x128xf32>
    %71 = vector.shape_cast %68 : vector<8x128xf32> to vector<1x8x128xf32>
    tpu.vector_store %arg10[%c0_34, %c0_35, %c0_36], %71 {strides = array<i32>} : memref<1x8x128xf32, #tpu.memory_space<vmem>>, vector<1x8x128xf32>,
    %c0_37 = arith.constant 0 : index
    %c0_38 = arith.constant 0 : index
    %c0_39 = arith.constant 0 : index
    %72 = vector.load %arg11[%c0_37, %c0_38, %c0_39] : memref<1x8x128xf32, #tpu.memory_space<vmem>>, vector<1x8x128xf32>
    %73 = vector.shape_cast %72 : vector<1x8x128xf32> to vector<8x128xf32>
    %74 = arith.mulf %39, %39 : vector<8x128xf32>
    %cst_40 = arith.constant 2.500000e-01 : f32
    %75 = vector.broadcast %cst_40 : f32 to vector<8x128xf32>
    %76 = arith.mulf %75, %74 : vector<8x128xf32>
    %77 = arith.addf %35, %76 : vector<8x128xf32>
    %78 = arith.mulf %61, %77 : vector<8x128xf32>
    %79 = vector.shape_cast %78 : vector<8x128xf32> to vector<1x8x128xf32>
    %cst_41 = arith.constant dense<0.000000e+00> : vector<8x128xf32>
    %80 = vector.multi_reduction <add>, %79, %cst_41 [0] : vector<1x8x128xf32> to vector<8x128xf32>
    %81 = arith.addf %73, %80 : vector<8x128xf32>
    %c0_42 = arith.constant 0 : index
    %c0_43 = arith.constant 0 : index
    %c0_44 = arith.constant 0 : index
    %82 = vector.load %arg11[%c0_42, %c0_43, %c0_44] : memref<1x8x128xf32, #tpu.memory_space<vmem>>, vector<1x8x128xf32>
    %83 = vector.shape_cast %82 : vector<1x8x128xf32> to vector<8x128xf32>
    %84 = vector.shape_cast %81 : vector<8x128xf32> to vector<1x8x128xf32>
    tpu.vector_store %arg11[%c0_42, %c0_43, %c0_44], %84 {strides = array<i32>} : memref<1x8x128xf32, #tpu.memory_space<vmem>>, vector<1x8x128xf32>,
    %c0_45 = arith.constant 0 : index
    %c0_46 = arith.constant 0 : index
    %c0_47 = arith.constant 0 : index
    %85 = vector.load %arg12[%c0_45, %c0_46, %c0_47] : memref<1x8x128xf32, #tpu.memory_space<vmem>>, vector<1x8x128xf32>
    %86 = vector.shape_cast %85 : vector<1x8x128xf32> to vector<8x128xf32>
    %87 = arith.mulf %40, %40 : vector<8x128xf32>
    %cst_48 = arith.constant 2.500000e-01 : f32
    %88 = vector.broadcast %cst_48 : f32 to vector<8x128xf32>
    %89 = arith.mulf %88, %87 : vector<8x128xf32>
    %90 = arith.addf %38, %89 : vector<8x128xf32>
    %91 = arith.mulf %62, %90 : vector<8x128xf32>
    %92 = vector.shape_cast %91 : vector<8x128xf32> to vector<1x8x128xf32>
    %cst_49 = arith.constant dense<0.000000e+00> : vector<8x128xf32>
    %93 = vector.multi_reduction <add>, %92, %cst_49 [0] : vector<1x8x128xf32> to vector<8x128xf32>
    %94 = arith.addf %86, %93 : vector<8x128xf32>
    %c0_50 = arith.constant 0 : index
    %c0_51 = arith.constant 0 : index
    %c0_52 = arith.constant 0 : index
    %95 = vector.load %arg12[%c0_50, %c0_51, %c0_52] : memref<1x8x128xf32, #tpu.memory_space<vmem>>, vector<1x8x128xf32>
    %96 = vector.shape_cast %95 : vector<1x8x128xf32> to vector<8x128xf32>
    %97 = vector.shape_cast %94 : vector<8x128xf32> to vector<1x8x128xf32>
    tpu.vector_store %arg12[%c0_50, %c0_51, %c0_52], %97 {strides = array<i32>} : memref<1x8x128xf32, #tpu.memory_space<vmem>>, vector<1x8x128xf32>,
    %c0_53 = arith.constant 0 : index
    %c0_54 = arith.constant 0 : index
    %c0_55 = arith.constant 0 : index
    %98 = vector.load %arg13[%c0_53, %c0_54, %c0_55] : memref<1x8x128xf32, #tpu.memory_space<vmem>>, vector<1x8x128xf32>
    %99 = vector.shape_cast %98 : vector<1x8x128xf32> to vector<8x128xf32>
    %100 = vector.shape_cast %60 : vector<8x128xf32> to vector<1x8x128xf32>
    %cst_56 = arith.constant dense<0.000000e+00> : vector<8x128xf32>
    %101 = vector.multi_reduction <add>, %100, %cst_56 [0] : vector<1x8x128xf32> to vector<8x128xf32>
    %102 = arith.addf %99, %101 : vector<8x128xf32>
    %c0_57 = arith.constant 0 : index
    %c0_58 = arith.constant 0 : index
    %c0_59 = arith.constant 0 : index
    %103 = vector.load %arg13[%c0_57, %c0_58, %c0_59] : memref<1x8x128xf32, #tpu.memory_space<vmem>>, vector<1x8x128xf32>
    %104 = vector.shape_cast %103 : vector<1x8x128xf32> to vector<8x128xf32>
    %105 = vector.shape_cast %102 : vector<8x128xf32> to vector<1x8x128xf32>
    tpu.vector_store %arg13[%c0_57, %c0_58, %c0_59], %105 {strides = array<i32>} : memref<1x8x128xf32, #tpu.memory_space<vmem>>, vector<1x8x128xf32>,
    %c0_60 = arith.constant 0 : index
    %c0_61 = arith.constant 0 : index
    %c0_62 = arith.constant 0 : index
    %106 = vector.load %arg14[%c0_60, %c0_61, %c0_62] : memref<1x8x128xf32, #tpu.memory_space<vmem>>, vector<1x8x128xf32>
    %107 = vector.shape_cast %106 : vector<1x8x128xf32> to vector<8x128xf32>
    %108 = vector.shape_cast %61 : vector<8x128xf32> to vector<1x8x128xf32>
    %cst_63 = arith.constant dense<0.000000e+00> : vector<8x128xf32>
    %109 = vector.multi_reduction <add>, %108, %cst_63 [0] : vector<1x8x128xf32> to vector<8x128xf32>
    %110 = arith.addf %107, %109 : vector<8x128xf32>
    %c0_64 = arith.constant 0 : index
    %c0_65 = arith.constant 0 : index
    %c0_66 = arith.constant 0 : index
    %111 = vector.load %arg14[%c0_64, %c0_65, %c0_66] : memref<1x8x128xf32, #tpu.memory_space<vmem>>, vector<1x8x128xf32>
    %112 = vector.shape_cast %111 : vector<1x8x128xf32> to vector<8x128xf32>
    %113 = vector.shape_cast %110 : vector<8x128xf32> to vector<1x8x128xf32>
    tpu.vector_store %arg14[%c0_64, %c0_65, %c0_66], %113 {strides = array<i32>} : memref<1x8x128xf32, #tpu.memory_space<vmem>>, vector<1x8x128xf32>,
    %c0_67 = arith.constant 0 : index
    %c0_68 = arith.constant 0 : index
    %c0_69 = arith.constant 0 : index
    %114 = vector.load %arg15[%c0_67, %c0_68, %c0_69] : memref<1x8x128xf32, #tpu.memory_space<vmem>>, vector<1x8x128xf32>
    %115 = vector.shape_cast %114 : vector<1x8x128xf32> to vector<8x128xf32>
    %116 = vector.shape_cast %62 : vector<8x128xf32> to vector<1x8x128xf32>
    %cst_70 = arith.constant dense<0.000000e+00> : vector<8x128xf32>
    %117 = vector.multi_reduction <add>, %116, %cst_70 [0] : vector<1x8x128xf32> to vector<8x128xf32>
    %118 = arith.addf %115, %117 : vector<8x128xf32>
    %c0_71 = arith.constant 0 : index
    %c0_72 = arith.constant 0 : index
    %c0_73 = arith.constant 0 : index
    %119 = vector.load %arg15[%c0_71, %c0_72, %c0_73] : memref<1x8x128xf32, #tpu.memory_space<vmem>>, vector<1x8x128xf32>
    %120 = vector.shape_cast %119 : vector<1x8x128xf32> to vector<8x128xf32>
    %121 = vector.shape_cast %118 : vector<8x128xf32> to vector<1x8x128xf32>
    tpu.vector_store %arg15[%c0_71, %c0_72, %c0_73], %121 {strides = array<i32>} : memref<1x8x128xf32, #tpu.memory_space<vmem>>, vector<1x8x128xf32>,
    return
  }
  func.func @transform_0(%arg0: i32, %arg1: i32) -> i32 {
    %c0_i32 = arith.constant 0 : i32
    %c0_i32_0 = arith.constant 0 : i32
    return %c0_i32 : i32
  }
  func.func @transform_1(%arg0: i32, %arg1: i32) -> (i32, i32) {
    %c0_i32 = arith.constant 0 : i32
    %c0_i32_0 = arith.constant 0 : i32
    %c0_i32_1 = arith.constant 0 : i32
    return %c0_i32, %c0_i32_0 : i32, i32
  }
  func.func @transform_2(%arg0: i32, %arg1: i32) -> (i32, i32, i32) {
    %c0_i32 = arith.constant 0 : i32
    %c0_i32_0 = arith.constant 0 : i32
    return %arg0, %arg1, %c0_i32 : i32, i32, i32
  }
  func.func @transform_3(%arg0: i32, %arg1: i32) -> (i32, i32, i32) {
    %c0_i32 = arith.constant 0 : i32
    %c0_i32_0 = arith.constant 0 : i32
    return %arg0, %arg1, %c0_i32 : i32, i32, i32
  }
  func.func @transform_4(%arg0: i32, %arg1: i32) -> (i32, i32, i32) {
    %c2_i32 = arith.constant 2 : i32
    %0 = arith.addi %arg0, %c2_i32 : i32
    %c4_i32 = arith.constant 4 : i32
    %c0_i32 = arith.constant 0 : i32
    %1 = arith.cmpi eq, %c4_i32, %c0_i32 : i32
    %c1_i32 = arith.constant 1 : i32
    %2 = arith.select %1, %c1_i32, %c4_i32 : i32
    %3 = arith.remsi %0, %2 : i32
    %c0_i32_0 = arith.constant 0 : i32
    %4 = arith.cmpi ne, %3, %c0_i32_0 : i32
    %c0_i32_1 = arith.constant 0 : i32
    %5 = arith.cmpi slt, %3, %c0_i32_1 : i32
    %c0_i32_2 = arith.constant 0 : i32
    %6 = arith.cmpi slt, %2, %c0_i32_2 : i32
    %7 = arith.xori %5, %6 : i1
    %8 = arith.andi %7, %4 : i1
    %9 = arith.addi %3, %2 : i32
    %10 = arith.select %8, %9, %3 : i32
    %c0_i32_3 = arith.constant 0 : i32
    %c0_i32_4 = arith.constant 0 : i32
    return %10, %arg1, %c0_i32_3 : i32, i32, i32
  }
  func.func @transform_5(%arg0: i32, %arg1: i32) -> (i32, i32, i32) {
    %c0_i32 = arith.constant 0 : i32
    %c0_i32_0 = arith.constant 0 : i32
    return %arg0, %arg1, %c0_i32 : i32, i32, i32
  }
  func.func @transform_6(%arg0: i32, %arg1: i32) -> (i32, i32, i32) {
    %c2_i32 = arith.constant 2 : i32
    %0 = arith.addi %arg0, %c2_i32 : i32
    %c4_i32 = arith.constant 4 : i32
    %c0_i32 = arith.constant 0 : i32
    %1 = arith.cmpi eq, %c4_i32, %c0_i32 : i32
    %c1_i32 = arith.constant 1 : i32
    %2 = arith.select %1, %c1_i32, %c4_i32 : i32
    %3 = arith.remsi %0, %2 : i32
    %c0_i32_0 = arith.constant 0 : i32
    %4 = arith.cmpi ne, %3, %c0_i32_0 : i32
    %c0_i32_1 = arith.constant 0 : i32
    %5 = arith.cmpi slt, %3, %c0_i32_1 : i32
    %c0_i32_2 = arith.constant 0 : i32
    %6 = arith.cmpi slt, %2, %c0_i32_2 : i32
    %7 = arith.xori %5, %6 : i1
    %8 = arith.andi %7, %4 : i1
    %9 = arith.addi %3, %2 : i32
    %10 = arith.select %8, %9, %3 : i32
    %c0_i32_3 = arith.constant 0 : i32
    %c0_i32_4 = arith.constant 0 : i32
    return %10, %arg1, %c0_i32_3 : i32, i32, i32
  }
  func.func @transform_7(%arg0: i32, %arg1: i32) -> (i32, i32, i32) {
    %c0_i32 = arith.constant 0 : i32
    %c0_i32_0 = arith.constant 0 : i32
    return %arg0, %arg1, %c0_i32 : i32, i32, i32
  }
  func.func @transform_8(%arg0: i32, %arg1: i32) -> (i32, i32, i32) {
    %c0_i32 = arith.constant 0 : i32
    %c0_i32_0 = arith.constant 0 : i32
    %c0_i32_1 = arith.constant 0 : i32
    return %arg0, %c0_i32, %c0_i32_0 : i32, i32, i32
  }
  func.func @transform_9(%arg0: i32, %arg1: i32) -> (i32, i32, i32) {
    %c0_i32 = arith.constant 0 : i32
    %c0_i32_0 = arith.constant 0 : i32
    %c0_i32_1 = arith.constant 0 : i32
    return %arg0, %c0_i32, %c0_i32_0 : i32, i32, i32
  }
  func.func @transform_10(%arg0: i32, %arg1: i32) -> (i32, i32, i32) {
    %c0_i32 = arith.constant 0 : i32
    %c0_i32_0 = arith.constant 0 : i32
    %c0_i32_1 = arith.constant 0 : i32
    return %arg0, %c0_i32, %c0_i32_0 : i32, i32, i32
  }
  func.func @transform_11(%arg0: i32, %arg1: i32) -> (i32, i32, i32) {
    %c0_i32 = arith.constant 0 : i32
    %c0_i32_0 = arith.constant 0 : i32
    %c0_i32_1 = arith.constant 0 : i32
    return %arg0, %c0_i32, %c0_i32_0 : i32, i32, i32
  }
  func.func @transform_12(%arg0: i32, %arg1: i32) -> (i32, i32, i32) {
    %c0_i32 = arith.constant 0 : i32
    %c0_i32_0 = arith.constant 0 : i32
    %c0_i32_1 = arith.constant 0 : i32
    return %arg0, %c0_i32, %c0_i32_0 : i32, i32, i32
  }
  func.func @transform_13(%arg0: i32, %arg1: i32) -> (i32, i32, i32) {
    %c0_i32 = arith.constant 0 : i32
    %c0_i32_0 = arith.constant 0 : i32
    %c0_i32_1 = arith.constant 0 : i32
    return %arg0, %c0_i32, %c0_i32_0 : i32, i32, i32
  }
}

</mosaic_0001>

<bundles_post_ra>
// kernel: _isd_loss_impl.1
= control target key start
LH: loop header
LB: loop body
LE: loop exit
PB: predicated region body
PF: predicated region fallthrough
CT: control target
= control target key end

     0   :  { %s1705_s27 = smov 0   ;;  %s1707_s28 = smov 0   ;;  %s1860_s0 = inlined_call_operand.<no memory space> [shape: f32[1], index: 0, kind: input, shape index: {}]   ;;  %s1861_s1 = inlined_call_operand.vmem [shape: f32[128,128], index: 1, kind: input, shape index: {}]   ;;  %s1862_s2 = inlined_call_operand.vmem [shape: f32[4,8,128], index: 2, kind: input, shape index: {}]   ;;  %s1863_s3 = inlined_call_operand.vmem [shape: f32[4,8,128], index: 3, kind: input, shape index: {}]   ;;  %s1864_s4 = inlined_call_operand.vmem [shape: f32[4,8,128], index: 4, kind: input, shape index: {}]   ;;  %s1865_s5 = inlined_call_operand.vmem [shape: f32[4,8,128], index: 5, kind: input, shape index: {}]   ;;  %s1866_s6 = inlined_call_operand.vmem [shape: f32[4,8,128], index: 6, kind: input, shape index: {}]   ;;  %s1867_s7 = inlined_call_operand.vmem [shape: f32[4,8,128], index: 7, kind: input, shape index: {}]   ;;  %s1868_s8 = inlined_call_operand.vmem [shape: f32[4,8,128], index: 8, kind: output, shape index: {0}]   ;;  %s1869_s9 = inlined_call_operand.vmem [shape: f32[4,8,128], index: 9, kind: output, shape index: {1}]   ;;  %s1870_s10 = inlined_call_operand.vmem [shape: f32[4,8,128], index: 10, kind: output, shape index: {2}]   ;;  %s1871_s11 = inlined_call_operand.vmem [shape: f32[4,8,128], index: 11, kind: output, shape index: {3}]   ;;  %s1872_s12 = inlined_call_operand.vmem [shape: f32[4,8,128], index: 12, kind: output, shape index: {4}]   ;;  %s1873_s13 = inlined_call_operand.vmem [shape: f32[4,8,128], index: 13, kind: output, shape index: {5}]  }
   0x1   :  { %1874 = sst [smem:[#allocation3_spill]] %s1861_s1  ;;  %s1709_s29 = smov 0  }
   0x2   :  { %19 = sst [smem:[#allocation2]] %s1860_s0 }
   0x3 LB: > { %s37_s0 = sadd.s32 1, %s1622_s28  ;;  %p1389_p0 = scmp.ge.s32.totalorder %s1626_s29, 1  ;;  %s1626_s29 = sphi %s1709_s29, %s25_s29   ;;  %s1622_s28 = sphi %s1707_s28, %s1877_s28   ;;  %s1618_s27 = sphi %s1705_s27, %s1876_s27  }
   0x4   : > { %p39_p1 = scmp.ge.s32.totalorder %s37_s0, 4  ;;  %p589_p2 = scmp.lt.s32.totalorder %s1626_s29, 5 }
   0x6   : > { %s1879_s0 = smov (%p39_p1, %s37_s0), 0  ;;  %p590_p3 = pnand %p1389_p0, %p589_p2 }
   0x7   : > { %s1875_s1 = sld [smem:[#allocation3_spill]] (!%p590_p3)  ;;  %v1628_v3 = vmov (!%p590_p3), 0.0|0.0   ;;  %s729_s21 = sadd.s32 (!%p590_p3), 2, %s1618_s27  ;;  %vm1629_vm0 = vmmov (!%p590_p3), 0   ;;  %v1630_v6 = vmov (!%p590_p3), 0.0   ;;  %v1631_v28 = vmov (!%p590_p3), 1.0  }
   0x8   : > { %593 = sbr.rel (%p590_p3) target bundleno = 268 (0x10c), region = 52  ;;  %1520 = vmatprep.subr.bf16.mxu0 (!%p590_p3), %v1628_v3  ;;  %1544 = vmatprep.subr.bf16.mxu1 (!%p590_p3), %v1628_v3  ;;  %s731_s22 = ssub.s32 (!%p590_p3), 0, %s729_s21 }
   0x9   : > { %1482 = vmatprep.mubr.msk.f32.mxu0 (!%p590_p3), %vm1629_vm0, %v1630_v6  ;;  %1517 = vmatprep.mubr.msk.f32.mxu1 (!%p590_p3), %vm1629_vm0, %v1630_v6  ;;  %p730_p4 = scmp.lt.s32.totalorder (!%p590_p3), %s729_s21, 0  ;;  %s1392_s30 = smin.u32 (!%p590_p3), %s731_s22, %s729_s21 }
   0xa   : > { %s733_s14 = sand.u32 (!%p590_p3), 3, %s1392_s30   ;;  %p715_p6 = scmp.lt.s32.totalorder (!%p590_p3), %s1618_s27, 3 }
   0xb   : > { %s734_s15 = ssub.s32 (!%p590_p3), 0, %s733_s14  ;;  %s843_s17 = sld [smem:[#allocation2]] (!%p590_p3) }
   0xd   : > { %v875_v0 = vld [vmem:[%s1875_s1] sm:$0xff] (!%p590_p3)  ;;  %v876_v1 = vld [vmem:[%s1875_s1 + $0x8] sm:$0xff] (!%p590_p3)  ;;  %v877_v2 = vld [vmem:[%s1875_s1 + $0x10] sm:$0xff] (!%p590_p3) }
   0xe   : > { %v1521_v4 = vpack.c.bf16 (!%p590_p3), %v876_v1, %v875_v0  ;;  %v878_v5 = vld [vmem:[%s1875_s1 + $0x18] sm:$0xff] (!%p590_p3)  ;;  %v879_v8 = vld [vmem:[%s1875_s1 + $0x20] sm:$0xff] (!%p590_p3)  ;;  %v880_v9 = vld [vmem:[%s1875_s1 + $0x28] sm:$0xff] (!%p590_p3) }
   0xf   : > { %v1524_v7 = vpack.c.bf16 %v878_v5, %v877_v2  ;;  %v1527_v10 = vpack.c.bf16 %v880_v9, %v879_v8  ;;  %v881_v11 = vld [vmem:[%s1875_s1 + $0x30] sm:$0xff]  ;;  %v882_v12 = vld [vmem:[%s1875_s1 + $0x38] sm:$0xff]  ;;  %s1881_s15 = smov (!%p730_p4, %s734_s15), %s733_s14  ;;  %v883_v14 = vld [vmem:[%s1875_s1 + $0x40] sm:$0xff]  ;;  %s1885_s27 = smov (!%p715_p6, %s1618_s27), 3 }
  0x10   : > { %1522 = vmatpush3.bf16.msra.mxu0 %v1521_v4  ;;  %1546 = vmatpush3.bf16.msra.mxu1 %v1521_v4  ;;  %p1394_p5 = scmp.lt.s32.totalorder %s1881_s15, 0  ;;  %s740_s20 = sadd.s32 4, %s1881_s15  ;;  %v1530_v13 = vpack.c.bf16 %v882_v12, %v881_v11  ;;  %v884_v15 = vld [vmem:[%s1875_s1 + $0x48] sm:$0xff]  ;;  %v885_v17 = vld [vmem:[%s1875_s1 + $0x50] sm:$0xff]  ;;  %v886_v18 = vld [vmem:[%s1875_s1 + $0x58] sm:$0xff] }
  0x11   : > { %1523 = vmatprep.subr.bf16.mxu0 %v1628_v3  ;;  %1547 = vmatprep.subr.bf16.mxu1 %v1628_v3  ;;  %v1533_v16 = vpack.c.bf16 %v884_v15, %v883_v14  ;;  %v1536_v19 = vpack.c.bf16 %v886_v18, %v885_v17  ;;  %v887_v20 = vld [vmem:[%s1875_s1 + $0x60] sm:$0xff]  ;;  %v888_v21 = vld [vmem:[%s1875_s1 + $0x68] sm:$0xff]  ;;  %s1786_s19 = sshll.u32 %s1885_s27, 3  ;;  %v889_v23 = vld [vmem:[%s1875_s1 + $0x70] sm:$0xff]  ;;  %v852_v30 = vstv %s843_s17 }
  0x12   : > { %s1883_s20 = smov (!%p1394_p5, %s740_s20), %s1881_s15  ;;  %v1539_v22 = vpack.c.bf16 %v888_v21, %v887_v20  ;;  %v890_v24 = vld [vmem:[%s1875_s1 + $0x78] sm:$0xff]  ;;  %s721_s30 = scalar_lea.vmem %s1862_s2, %s1786_s19 }
  0x13   : > { %p742_p7 = scmp.lt.s32.totalorder %s1883_s20, 3  ;;  %v1542_v25 = vpack.c.bf16 %v890_v24, %v889_v23  ;;  %v844_v26 = vld [vmem:[%s721_s30] sm:$0xff]  ;;  %s768_s23 = scalar_lea.vmem %s1865_s5, %s1786_s19 }
  0x14   : > { %1525 = vmatpush3.bf16.msra.mxu0 %v1524_v7  ;;  %1549 = vmatpush3.bf16.msra.mxu1 %v1524_v7  ;;  %vm891_vm1 = vcmp.gt.f32.partialorder %v844_v26, 0.5  ;;  %v846_v32 = vld [vmem:[%s768_s23] sm:$0xff]  ;;  %v863_v35 = vadd.f32 1e-07, %v844_v26  ;;  %s728_s14 = scalar_lea.vmem %s1863_s3, %s1786_s19  ;;  %s808_s17 = scalar_lea.vmem %s1867_s7, %s1786_s19 }
  0x15   : > { %1526 = vmatprep.subr.bf16.mxu0 %v1628_v3  ;;  %1550 = vmatprep.subr.bf16.mxu1 %v1628_v3  ;;  %s1887_s20 = smov (!%p742_p7, %s1883_s20), 3  ;;  %v850_v33 = vadd.f32 1e-07, %v846_v32  ;;  %v847_v42 = vld [vmem:[%s728_s14] sm:$0xff]  ;;  %s824_s18 = scalar_lea.vmem %s1871_s11, %s1786_s19 }
  0x16   : > { %s1395_s21 = sshll.u32 %s1887_s20, 3  ;;  %v849_v43 = vld [vmem:[%s808_s17] sm:$0xff]  ;;  %s812_s24 = scalar_lea.vmem %s1868_s8, %s1786_s19 }
  0x17   : > { %s748_s16 = scalar_lea.vmem %s1864_s4, %s1395_s21  ;;  %1596 = vlog2.f32 %v850_v33  ;;  %s788_s26 = scalar_lea.vmem %s1866_s6, %s1395_s21  ;;  %v873_v48 = vsub.f32 %v849_v43, %v847_v42 }
  0x18   : > { %1528 = vmatpush3.bf16.msra.mxu0 %v1527_v10  ;;  %1552 = vmatpush3.bf16.msra.mxu1 %v1527_v10  ;;  %v845_v27 = vld [vmem:[%s748_s16] sm:$0xff]  ;;  %1598 = vlog2.f32 %v863_v35  ;;  %s828_s27 = scalar_lea.vmem %s1872_s12, %s1786_s19  ;;  %s832_s15 = scalar_lea.vmem %s1873_s13, %s1786_s19 }
  0x19   : > { %1529 = vmatprep.subr.bf16.mxu0 %v1628_v3  ;;  %1553 = vmatprep.subr.bf16.mxu1 %v1628_v3  ;;  %vm894_vm2 = vcmp.gt.f32.partialorder %v845_v27, 0.5  ;;  %v851_v29 = vsub.f32 %v844_v26, %v845_v27  ;;  %v864_v36 = vadd.f32 1e-07, %v845_v27  ;;  %v848_v41 = vld [vmem:[%s788_s26] sm:$0xff]  ;;  %v1052_v53 = vmul.f32 %v873_v48, %v873_v48  ;;  %s816_s20 = scalar_lea.vmem %s1869_s9, %s1786_s19  ;;  %s820_s22 = scalar_lea.vmem %s1870_s10, %s1786_s19 }
  0x1a   : > { %v874_v49 = vsub.f32 %v849_v43, %v848_v41 }
  0x1b   : > { %v853_v31 = vmul.f32 %v852_v30, %v851_v29  ;;  %1600 = vlog2.f32 %v864_v36  ;;  %v1053_v59 = vmul.f32 0.25, %v1052_v53 }
  0x1c   : > { %1531 = vmatpush3.bf16.msra.mxu0 %v1530_v13  ;;  %1555 = vmatpush3.bf16.msra.mxu1 %v1530_v13  ;;  %v1060_v54 = vmul.f32 %v874_v49, %v874_v49 }
  0x1d   : > { %1532 = vmatprep.subr.bf16.mxu0 %v1628_v3  ;;  %1556 = vmatprep.subr.bf16.mxu1 %v1628_v3  ;;  %v854_v34 = vadd.f32 %v853_v31, %v845_v27 }
  0x1e   : > { %v1061_v60 = vmul.f32 0.25, %v1060_v54 }
  0x1f   : > { %v855_v37 = vadd.f32 1e-07, %v854_v34 }
  0x20   : > { %1534 = vmatpush3.bf16.msra.mxu0 %v1533_v16  ;;  %1558 = vmatpush3.bf16.msra.mxu1 %v1533_v16 }
  0x21   : > { %1535 = vmatprep.subr.bf16.mxu0 %v1628_v3  ;;  %1559 = vmatprep.subr.bf16.mxu1 %v1628_v3  ;;  %1602 = vlog2.f32 %v855_v37  ;;  %v1597_v38 = vpop.eup %1596  ;;  %v860_v55 = vsub.f32 %v850_v33, %v855_v37 }
  0x22   : > { %v1599_v39 = vpop.eup %1598  ;;  %v859_v45 = vmul.f32 0.6931472, %v1597_v38 }
  0x23   : > { %v866_v46 = vmul.f32 0.6931472, %v1599_v39 }
  0x24   : > { %1537 = vmatpush3.bf16.msra.mxu0 %v1536_v19  ;;  %1561 = vmatpush3.bf16.msra.mxu1 %v1536_v19 }
  0x25   : > { %1538 = vmatprep.subr.bf16.mxu0 %v1628_v3  ;;  %1562 = vmatprep.subr.bf16.mxu1 %v1628_v3  ;;  %v1601_v40 = vpop.eup %1600  ;;  %v867_v51 = vsub.f32 %v866_v46, %v859_v45 }
  0x26   : > { %v870_v47 = vmul.f32 0.6931472, %v1601_v40 }
  0x27   : > { %v868_v57 = vmul.f32 %v867_v51, %v863_v35 }
  0x28   : > { %1540 = vmatpush3.bf16.msra.mxu0 %v1539_v22  ;;  %1564 = vmatpush3.bf16.msra.mxu1 %v1539_v22  ;;  %v871_v52 = vsub.f32 %v870_v47, %v859_v45 }
  0x29   : > { %1541 = vmatprep.subr.bf16.mxu0 %v1628_v3  ;;  %1565 = vmatprep.subr.bf16.mxu1 %v1628_v3  ;;  %v1054_v5 = vadd.f32 %v1053_v59, %v868_v57 }
  0x2a   : > { %v872_v58 = vmul.f32 %v871_v52, %v864_v36 }
  0x2b   : > { %v1603_v44 = vpop.eup %1602 }
  0x2c   : > { %1543 = vmatpush3.bf16.msra.mxu0 %v1542_v25  ;;  %1567 = vmatpush3.bf16.msra.mxu1 %v1542_v25  ;;  %v857_v50 = vmul.f32 0.6931472, %v1603_v44  ;;  %v1062_v7 = vadd.f32 %v1061_v60, %v872_v58 }
  0x2e   : > { %v861_v56 = vsub.f32 %v859_v45, %v857_v50 }
  0x2f   : > { %1483 = vmatmul.mubr.msk.f32.vlgmr.msra.gmra.mrb[0].mxu0 %vm891_vm1, %v1631_v28  ;;  %1518 = vmatmul.mubr.msk.f32.vlgmr.msra.gmra.mrb[0].mxu1 %vm894_vm2, %v1631_v28 }
  0x30   : > { %v862_v63 = vmul.f32 %v861_v56, %v860_v55 }
 0x102   : > { %v963_v61 = vpop.f32.mrb[0].mxu0  ;;  %v1033_v62 = vpop.f32.mrb[0].mxu1 }
 0x103   : > { %vm1037_vm3 = vcmp.gt.f32.partialorder %v963_v61, 0.5  ;;  %vm1040_vm4 = vcmp.gt.f32.partialorder %v1033_v62, 0.5  ;;  %v1484_v0 = vpop.f32.mrb[1].mxu0  ;;  %v1519_v1 = vpop.f32.mrb[1].mxu1 }
 0x104   : > { %v1412_v2 = vsel %vm1037_vm3, 1.0, %v1630_v6  ;;  %v1413_v3 = vsel %vm1040_vm4, 1.0, %v1630_v6 }
 0x105   : > { %v1043_v4 = vmul.f32 %v1413_v3, %v1412_v2 }
 0x107   : > { %v1044_v8 = vsub.f32 %v1412_v2, %v1043_v4  ;;  %v1045_v9 = vsub.f32 %v1413_v3, %v1043_v4  ;;  %v1047_v10 = vmul.f32 %v1043_v4, %v862_v63  ;;  %1070 = vst [vmem:[%s824_s18] sm:$0xff] %v1043_v4 }
 0x109   : > { %v1055_v6 = vmul.f32 %v1054_v5, %v1044_v8  ;;  %v1063_v11 = vmul.f32 %v1062_v7, %v1045_v9  ;;  %1050 = vst [vmem:[%s812_s24] sm:$0xff] %v1047_v10  ;;  %1074 = vst [vmem:[%s828_s27] sm:$0xff] %v1044_v8 }
 0x10a   : > { %1078 = vst [vmem:[%s832_s15] sm:$0xff] %v1045_v9 }
 0x10b   : > { %1058 = vst [vmem:[%s816_s20] sm:$0xff] %v1055_v6  ;;  %1066 = vst [vmem:[%s820_s22] sm:$0xff] %v1063_v11 }
 0x10c PF: > { %s25_s29 = sadd.s32 1, %s1626_s29   ;;  %s1876_s27 = smov %s1622_s28 }
 0x10d   : > { %p22_p8 = scmp.ge.s32.totalorder %s25_s29, 6   ;;  %s1877_s28 = smov %s1879_s0 }
 0x10f   :  { %24 = sbr.rel (!%p22_p8) target bundleno = 3 (0x3), region = 161 }

</bundles_post_ra>
